<compile_context>
chip_gen: v7x
topology: tpu7x:2x2x1
jax: 0.10.0
libtpu: 0.0.40
codegen_flags: <defaults>
</compile_context>

<pallas_src>
import numpy as np

import jax
import jax.numpy as jnp
from jax.experimental import pallas as pl
from jax.experimental.pallas import tpu as pltpu


_TARGET_BLOCK_BYTES = 8 << 20  # ~8 MiB per x block (review: 4-8 MiB sweet spot)
_LANE_ALIGN = 128


def _unnormalize_kernel(x_ref, p_ref, o_ref):
    # x_ref, o_ref: (tile_rows, tile_hw) VMEM tiles
    # p_ref:        (tile_rows, 2) f32; column 0 = std (scale), column 1 = mean (shift)
    x = x_ref[...].astype(jnp.float32)
    scale = p_ref[:, 0:1]
    shift = p_ref[:, 1:2]
    o_ref[...] = (x * scale + shift).astype(o_ref.dtype)


def _select_tiles(NC, HW, itemsize):
    """Pick (tile_rows, tile_hw) for the (NC, HW) slab.

    Rules:
      * block byte footprint <= _TARGET_BLOCK_BYTES,
      * rows are the full extent or a multiple of the dtype-aware alignment,
      * lanes are the full extent or a multiple of 128,
      * prefer full-HW lane tiles (one contiguous DMA per block),
      * guarantee >= 2 grid steps whenever the slab exceeds ~2 MiB (v7x megacore).
    """
    row_align = max(8, 32 // itemsize)  # 8 for f32, 16 for bf16, 32 for int8/fp8
    budget_elems = _TARGET_BLOCK_BYTES // itemsize

    if HW * itemsize * min(NC, row_align) <= _TARGET_BLOCK_BYTES:
        # Full-HW lane tiles: each block is one fully contiguous HBM DMA.
        tile_hw = HW
        rows_fit = max(row_align, budget_elems // max(HW, 1))
        if NC <= rows_fit:
            tile_rows = NC
        else:
            tile_rows = max(row_align, (rows_fit // row_align) * row_align)
    else:
        # A single aligned row-group of full HW already exceeds the budget:
        # keep the row tile minimal and tile the flattened spatial dim.
        tile_rows = NC if NC <= row_align else row_align
        lanes_fit = max(_LANE_ALIGN, budget_elems // tile_rows)
        if HW <= lanes_fit:
            tile_hw = HW
        else:
            tile_hw = max(_LANE_ALIGN, (lanes_fit // _LANE_ALIGN) * _LANE_ALIGN)

    # Megacore: make sure there are >= 2 grid steps to shard when the data is
    # big enough to matter (no effect on single-TC v5e/v6e).
    total_bytes = NC * HW * itemsize
    n_steps = pl.cdiv(NC, tile_rows) * pl.cdiv(HW, tile_hw)
    if n_steps < 2 and total_bytes > (2 << 20):
        if NC >= 2 * row_align:
            half = NC // 2
            tile_rows = max(row_align, ((half + row_align - 1) // row_align) * row_align)
        elif HW >= 2 * _LANE_ALIGN:
            half = HW // 2
            tile_hw = max(_LANE_ALIGN, ((half + _LANE_ALIGN - 1) // _LANE_ALIGN) * _LANE_ALIGN)

    return tile_rows, tile_hw


def unnormalize_pallas(x, mean, std, inplace=False):
    """x: (N, C, H, W). mean, std: f32 arrays of shape (C,) or (1,) (broadcast).

    `inplace=True` only aliases the output onto x's buffer when the caller
    donates x; it does not change HBM traffic (one read + one write per elem).
    """
    if x.ndim != 4:
        raise ValueError(
            "Expected tensor of size (N, C, H, W). Got shape = {}.".format(x.shape)
        )
    N, C, H, W = x.shape
    NC, HW = N * C, H * W
    dtype = x.dtype
    itemsize = jnp.dtype(dtype).itemsize

    mean = jnp.broadcast_to(jnp.asarray(mean, jnp.float32).reshape(-1), (C,))
    std = jnp.broadcast_to(jnp.asarray(std, jnp.float32).reshape(-1), (C,))

    # Per-row (n, c) affine parameters, merged into a single (NC, 2) array.
    # Rows of the flattened slab are ordered (n0c0, n0c1, ...): channel = row % C.
    scale_rows = jnp.tile(std, (N,))
    shift_rows = jnp.tile(mean, (N,))
    params = jnp.stack([scale_rows, shift_rows], axis=-1)  # (NC, 2) f32

    x2 = x.reshape(NC, HW)  # free reshape for contiguous NCHW

    tile_rows, tile_hw = _select_tiles(NC, HW, itemsize)
    grid = (pl.cdiv(NC, tile_rows), pl.cdiv(HW, tile_hw))  # HW axis innermost

    # VMEM budget: x in + out double-buffered + lane-padded param block + slack.
    block_bytes = tile_rows * tile_hw * itemsize
    param_block_bytes = tile_rows * _LANE_ALIGN * 4  # (tile_rows, 2) pads lanes to 128
    vmem_limit = 4 * block_bytes + 2 * param_block_bytes + (2 << 20)
    vmem_limit = min(max(vmem_limit, 16 << 20), 56 << 20)  # stay under v7x 64 MiB

    grid_spec = pltpu.PrefetchScalarGridSpec(
        num_scalar_prefetch=0,
        grid=grid,
        in_specs=[
            pl.BlockSpec((tile_rows, tile_hw), lambda i, j: (i, j)),  # x slab tile
            # depends only on i -> not re-fetched across the inner (HW) loop
            pl.BlockSpec((tile_rows, 2), lambda i, j: (i, 0)),        # per-row std/mean
        ],
        out_specs=pl.BlockSpec((tile_rows, tile_hw), lambda i, j: (i, j)),
    )

    cost = pl.CostEstimate(
        flops=2 * N * C * H * W,
        transcendentals=0,
        bytes_accessed=2 * N * C * H * W * itemsize + NC * 2 * 4,
    )

    out2 = pl.pallas_call(
        _unnormalize_kernel,
        out_shape=jax.ShapeDtypeStruct((NC, HW), dtype),
        grid_spec=grid_spec,
        compiler_params=pltpu.CompilerParams(
            dimension_semantics=("parallel", "parallel"),
            vmem_limit_bytes=int(vmem_limit),
        ),
        cost_estimate=cost,
        # x2 is positional arg 0 (valid only while num_scalar_prefetch == 0).
        input_output_aliases=({0: 0} if inplace else {}),
    )(x2, params)

    return out2.reshape(N, C, H, W)


class Unnormalize:
    """JAX/Pallas port of the PyTorch Unnormalize helper module."""

    def __init__(self, mean=[0], std=[1], inplace=False):
        self.mean = mean
        self.std = std
        self.inplace = inplace  # arrays are immutable in JAX; only enables aliasing

        # Host-side validation (mirrors the PyTorch ValueError, no device sync).
        std_arr = np.asarray(std, dtype=np.float32).reshape(-1)
        if np.any(std_arr == 0):
            raise ValueError(
                "std evaluated to zero after conversion to float32, leading to "
                "division by zero."
            )
        # Cache converted f32 parameters so per-call work is just the kernel.
        self._mean_f32 = jnp.asarray(np.asarray(mean, dtype=np.float32).reshape(-1))
        self._std_f32 = jnp.asarray(std_arr)

    def __call__(self, x):
        return unnormalize_pallas(x, self._mean_f32, self._std_f32, inplace=self.inplace)


def _reference(x, mean, std):
    C = x.shape[1]
    mean_a = jnp.broadcast_to(jnp.asarray(mean, jnp.float32).reshape(-1), (C,))
    std_a = jnp.broadcast_to(jnp.asarray(std, jnp.float32).reshape(-1), (C,))
    out = x.astype(jnp.float32) * std_a[None, :, None, None] + mean_a[None, :, None, None]
    return out.astype(x.dtype)


if __name__ == "__main__":
    key = jax.random.PRNGKey(0)
    k1, k2, k3 = jax.random.split(key, 3)

    # Test 1: small shape consistent with the module (N=2, C=4, H=W=16).
    x1 = jax.random.normal(k1, (2, 4, 16, 16), dtype=jnp.float32)
    mean4 = [0.485, 0.456, 0.406, 0.40]
    std4 = [0.229, 0.224, 0.225, 0.20]
    module = Unnormalize(mean=mean4, std=std4)
    out1 = jax.block_until_ready(module(x1))
    assert out1.shape == x1.shape and out1.dtype == x1.dtype
    assert jnp.allclose(out1, _reference(x1, mean4, std4), atol=1e-6, rtol=1e-6)

    # Test 2: wider spatial extent (HW = 8192), still a full-HW contiguous tile.
    x2 = jax.random.normal(k2, (2, 3, 64, 128), dtype=jnp.float32)
    mean3 = [0.485, 0.456, 0.406]
    std3 = [0.229, 0.224, 0.225]
    module3 = Unnormalize(mean=mean3, std=std3)
    out2 = jax.block_until_ready(module3(x2))
    assert jnp.allclose(out2, _reference(x2, mean3, std3), atol=1e-6, rtol=1e-6)

    # Test 3: HW not a multiple of 128 (full-extent lane tile path).
    x3 = jax.random.normal(k3, (1, 3, 96, 96), dtype=jnp.float32)
    out3 = jax.block_until_ready(module3(x3))
    assert jnp.allclose(out3, _reference(x3, mean3, std3), atol=1e-6, rtol=1e-6)

    # Test 4: default mean/std broadcast ([0], [1]) -> identity.
    ident = Unnormalize()
    out4 = jax.block_until_ready(ident(x1))
    assert jnp.allclose(out4, x1, atol=1e-6, rtol=1e-6)

    # Test 5: bf16 input exercises the dtype-aware alignment / f32-compute path.
    x5 = x1.astype(jnp.bfloat16)
    out5 = jax.block_until_ready(module(x5))
    assert out5.dtype == jnp.bfloat16
    assert jnp.allclose(
        out5.astype(jnp.float32),
        _reference(x5, mean4, std4).astype(jnp.float32),
        atol=1e-6, rtol=1e-6,
    )

    print("KERNEL_OK")
</pallas_src>

<mosaic_0001>
module attributes {stable_mosaic.version = 11 : i64} {
  func.func @_unnormalize_kernel(%arg0: i32, %arg1: i32, %arg2: memref<8x256xf32, #tpu.memory_space<vmem>>, %arg3: memref<8x2xf32, #tpu.memory_space<vmem>>, %arg4: memref<8x256xf32, #tpu.memory_space<vmem>>) attributes {dimension_semantics = [#tpu.dimension_semantics<parallel>, #tpu.dimension_semantics<parallel>], iteration_bounds = array<i64: 1, 1>, scalar_prefetch = 0 : i64, scratch_operands = 0 : i64, tpu.core_type = #tpu.core_type<tc>, window_params = [{transform_indices = @transform_0, window_bounds = array<i64: 8, 256>}, {transform_indices = @transform_1, window_bounds = array<i64: 8, 2>}, {transform_indices = @transform_2, window_bounds = array<i64: 8, 256>}]} {
    %c0 = arith.constant 0 : index
    %c0_0 = arith.constant 0 : index
    %0 = vector.load %arg2[%c0, %c0_0] : memref<8x256xf32, #tpu.memory_space<vmem>>, vector<8x256xf32>
    %c0_1 = arith.constant 0 : index
    %c0_2 = arith.constant 0 : index
    %1 = vector.load %arg3[%c0_1, %c0_2] : memref<8x2xf32, #tpu.memory_space<vmem>>, vector<8x1xf32>
    %c0_3 = arith.constant 0 : index
    %c1 = arith.constant 1 : index
    %2 = vector.load %arg3[%c0_3, %c1] : memref<8x2xf32, #tpu.memory_space<vmem>>, vector<8x1xf32>
    %3 = vector.broadcast %1 : vector<8x1xf32> to vector<8x256xf32>
    %4 = arith.mulf %0, %3 : vector<8x256xf32>
    %5 = vector.broadcast %2 : vector<8x1xf32> to vector<8x256xf32>
    %6 = arith.addf %4, %5 : vector<8x256xf32>
    %c0_4 = arith.constant 0 : index
    %c0_5 = arith.constant 0 : index
    %7 = vector.load %arg4[%c0_4, %c0_5] : memref<8x256xf32, #tpu.memory_space<vmem>>, vector<8x256xf32>
    tpu.vector_store %arg4[%c0_4, %c0_5], %6 {strides = array<i32>} : memref<8x256xf32, #tpu.memory_space<vmem>>, vector<8x256xf32>,
    return
  }
  func.func @transform_0(%arg0: i32, %arg1: i32) -> (i32, i32) {
    %c0_i32 = arith.constant 0 : i32
    return %arg0, %arg1 : i32, i32
  }
  func.func @transform_1(%arg0: i32, %arg1: i32) -> (i32, i32) {
    %c0_i32 = arith.constant 0 : i32
    %c0_i32_0 = arith.constant 0 : i32
    return %arg0, %c0_i32 : i32, i32
  }
  func.func @transform_2(%arg0: i32, %arg1: i32) -> (i32, i32) {
    %c0_i32 = arith.constant 0 : i32
    return %arg0, %arg1 : i32, i32
  }
}

</mosaic_0001>

<bundles_post_ra>
// kernel: tpu_custom_call.1
= control target key start
LH: loop header
LB: loop body
LE: loop exit
PB: predicated region body
PF: predicated region fallthrough
CT: control target
= control target key end

     0   :  { %7 = vsyncpa [#allocation3], 0  ;;  %s157_s0 = inlined_call_operand.hbm [shape: f32[8,256], index: 0, kind: input, shape index: {}]   ;;  %s158_s1 = inlined_call_operand.vmem [shape: f32[8,2], index: 1, kind: input, shape index: {}]   ;;  %s159_s2 = inlined_call_operand.hbm [shape: f32[8,256], index: 2, kind: output, shape index: {}]  }
   0x1   :  { %8 = vsyncpa [#allocation4], 0  ;;  %s111_s9 = smov [#allocation2]   ;;  %s63_s13 = scalar_lea.hbm %s157_s0, 256 }
   0x2   :  { %s15_s10 = sshll.u32 %s111_s9, 4  ;;  %p64_p0 = scmp.ne.s32.totalorder %s157_s0, %s63_s13  ;;  %s16_s10 = int_to_ptr.vmem [resolvable:$true] %s15_s10 }
   0x3   :  { %p67_p1 = scmp.lt.u32.totalorder %s63_s13, %s157_s0 }
   0x5   :  { %p69_p2 = pnand %p67_p1, %p64_p0 }
   0x7   :  { %72 = shalt.err (!%p69_p2)
}
   0x8   :  { %s73_s18 = scalar_lea.vmem %s16_s10, 256  ;;  %p78_p4 = scmp.lt.s32.totalorder %s16_s10, %s16_s10 }
   0x9   :  { %p74_p3 = scmp.ne.s32.totalorder %s16_s10, %s73_s18  ;;  %p79_p5 = scmp.lt.s32.totalorder %s73_s18, %s73_s18 }
   0xb   :  { %p80_p6 = por %p79_p5, %p78_p4 }
   0xd   :  { %p81_p7 = pnand %p80_p6, %p74_p3 }
   0xf   :  { %84 = shalt.err (!%p81_p7)
}
  0x10   :  { %18 = dma.hbm_to_vmem [thread:$0]  %s157_s0, 256, %s16_s10, [#allocation3]  }
  0x11   :  { %107 = dma.done.wait [#allocation3], 256  }
  0x12   :  { %108 = vsyncadd [#allocation3], 4294967040  ;;  %v112_v0 = vmov 0   ;;  %v26_v1 = vld [vmem:[%s158_s1] sm:$0xff]  ;;  %v113_v2 = vmov 1   ;;  %v25_v5 = vld [vmem:[#allocation2 + $0x8] sm:$0xff] }
  0x13   :  { %61 = vset.pattern.permute.xlu0 %v112_v0  ;;  %v24_v4 = vld [vmem:[#allocation2] sm:$0xff]  ;;  %s114_s23 = smov [#allocation5]  }
  0x14   :  { %29 = vperm.xlu0 %61, %v26_v1   ;;  %s48_s24 = sshll.u32 %s114_s23, 4  ;;  %s49_s24 = int_to_ptr.vmem [resolvable:$true] %s48_s24 }
  0x15   :  { %s85_s0 = scalar_lea.vmem %s49_s24, 256  ;;  %p90_p9 = scmp.lt.s32.totalorder %s49_s24, %s49_s24 }
  0x16   :  { %p86_p8 = scmp.ne.s32.totalorder %s49_s24, %s85_s0  ;;  %p91_p10 = scmp.lt.s32.totalorder %s85_s0, %s85_s0 }
  0x18   :  { %62 = vset.pattern.permute.xlu0 %v113_v2  ;;  %p92_p11 = por %p91_p10, %p90_p9 }
  0x19   :  { %35 = vperm.xlu0 %62, %v26_v1  }
  0x1a   :  { %p93_p12 = pnand %p92_p11, %p86_p8 }
  0x93   :  { %v30_v3 = vpop.permute.xlu0 %29 }
  0x94   :  { %v32_v6 = vmul.f32 %v30_v3, %v24_v4  ;;  %v33_v7 = vmul.f32 %v30_v3, %v25_v5 }
  0x98   :  { %v36_v8 = vpop.permute.xlu0 %35 }
  0x99   :  { %v38_v9 = vadd.f32 %v36_v8, %v32_v6  ;;  %v39_v10 = vadd.f32 %v36_v8, %v33_v7 }
  0x9b   :  { %40 = vst [vmem:[#allocation5] sm:$0xff] %v38_v9  ;;  %41 = vst [vmem:[#allocation5 + $0x8] sm:$0xff] %v39_v10 }
  0x9c   :  { %96 = shalt.err (!%p93_p12)
}
  0x9d   :  { %s97_s26 = scalar_lea.hbm %s159_s2, 256 }
  0x9e   :  { %p98_p13 = scmp.ne.s32.totalorder %s159_s2, %s97_s26  ;;  %p101_p0 = scmp.lt.u32.totalorder %s97_s26, %s159_s2 }
  0xa0   :  { %p103_p1 = pnand %p101_p0, %p98_p13 }
  0xa2   :  { %106 = shalt.err (!%p103_p1)
}
  0xa3   :  { %51 = dma.vmem_to_hbm [thread:$0]  %s49_s24, 256, %s159_s2, [#allocation4]  }
  0xa4   :  { %109 = dma.done.wait [#allocation4], 256  }
  0xa5   :  { %110 = vsyncadd [#allocation4], 4294967040 }
  0xa6   :  { %55 = vsyncpa [#allocation3], 1 }
  0xa7   :  { %56 = vsyncpa [#allocation4], 1 }

</bundles_post_ra>
